<compile_context>
chip_gen: v7x
topology: tpu7x:2x2x1
jax: 0.10.0
libtpu: 0.0.40
codegen_flags: <defaults>
</compile_context>

<pallas_src>
import math

import jax
import jax.numpy as jnp
from jax.experimental import pallas as pl
from jax.experimental.pallas import tpu as pltpu


# Soft per-step block-payload budget (bytes). Double-buffered working set is
# ~2x this, which fits comfortably inside every generation's default scoped
# VMEM limit (v5e 16 MiB, v6e/v7x 32 MiB) without special compiler params.
_PAYLOAD_BUDGET = 4 << 20


def _sublane(dtype):
    """Minimum sublane granularity for a given dtype (packing-aware)."""
    return {4: 8, 2: 16, 1: 32}.get(jnp.dtype(dtype).itemsize, 8)


def make_pe_table(d_model, max_len=5000, dtype=jnp.float32):
    """Sinusoidal positional-encoding buffer, identical to the PyTorch __init__."""
    position = jnp.arange(max_len, dtype=jnp.float32)[:, None]          # (L, 1)
    div_term = jnp.exp(
        jnp.arange(0, d_model, 2, dtype=jnp.float32)
        * (-(math.log(10000.0) / d_model))
    )                                                                   # (D/2,)
    angles = position * div_term                                        # (L, D/2)
    pe = jnp.zeros((max_len, d_model), jnp.float32)
    pe = pe.at[:, 0::2].set(jnp.sin(angles))
    pe = pe.at[:, 1::2].set(jnp.cos(angles))
    return pe.astype(dtype)


# ----------------------------------------------------------------------------
# Kernel: out = (x + pe) with pe broadcast over the batch block.
#   3D path : x (tB, ts, D),  pe (ts, D)   -> broadcast over leading dim
#   flat path: x (tB, tL),    pe (1, tL)   -> broadcast over leading dim
# ----------------------------------------------------------------------------
def _pe_add_kernel(x_ref, pe_ref, o_ref):
    o_ref[...] = (
        x_ref[...].astype(jnp.float32) + pe_ref[...].astype(jnp.float32)
    ).astype(o_ref.dtype)


def _cost(B, S, D, x_itemsize, pe_itemsize):
    return pl.CostEstimate(
        flops=B * S * D,
        transcendentals=0,
        bytes_accessed=2 * B * S * D * x_itemsize + S * D * pe_itemsize,
    )


def _pos_enc_3d(x, pe_s):
    """Lane-dense path: D is a multiple of 128. x: (B,S,D), pe_s: (S,D)."""
    B, S, D = x.shape
    isz = jnp.dtype(x.dtype).itemsize
    pisz = jnp.dtype(pe_s.dtype).itemsize
    sub = _sublane(x.dtype)

    def payload(tb, ts):
        return ts * D * (2 * tb * isz + pisz)

    ts_min = S if S < sub else sub
    if payload(B, ts_min) <= _PAYLOAD_BUDGET:
        # Fold the whole batch into the block; grow the seq tile to the budget.
        tB = B
        if payload(B, S) <= _PAYLOAD_BUDGET:
            ts = S
        else:
            ts = max(sub, (_PAYLOAD_BUDGET // (D * (2 * B * isz + pisz))) // sub * sub)
    else:
        # Batch too large to fold fully: small seq tile, tile the batch instead.
        ts = ts_min
        tB = max(1, int((_PAYLOAD_BUDGET // (ts * D) - pisz) // (2 * isz)))
        tB = min(tB, B)

    grid = (pl.cdiv(S, ts), pl.cdiv(B, tB))  # seq tiles OUTER -> pe re-DMA elided over batch

    return pl.pallas_call(
        _pe_add_kernel,
        out_shape=jax.ShapeDtypeStruct((B, S, D), x.dtype),
        grid=grid,
        in_specs=[
            pl.BlockSpec((tB, ts, D), lambda s, b: (b, s, 0)),   # x tile
            pl.BlockSpec((ts, D), lambda s, b: (s, 0)),          # pe tile (batch-invariant)
        ],
        out_specs=pl.BlockSpec((tB, ts, D), lambda s, b: (b, s, 0)),
        compiler_params=pltpu.CompilerParams(
            dimension_semantics=("parallel", "parallel"),
        ),
        cost_estimate=_cost(B, S, D, isz, pisz),
    )(x, pe_s)


def _pos_enc_flat(x, pe_s):
    """D not a multiple of 128: flatten (S, D) into a lane-dense axis."""
    B, S, D = x.shape
    L = S * D
    isz = jnp.dtype(x.dtype).itemsize
    pisz = jnp.dtype(pe_s.dtype).itemsize

    x2 = x.reshape(B, L)               # contiguous, free
    pe2 = pe_s.reshape(1, L)           # (1, S*D), broadcast over batch in-kernel

    col_bytes = 2 * B * isz + pisz
    tl_min = L if L < 128 else 128
    if tl_min * col_bytes <= _PAYLOAD_BUDGET:
        tB = B
        if L * col_bytes <= _PAYLOAD_BUDGET:
            tL = L
        else:
            tL = max(128, (_PAYLOAD_BUDGET // col_bytes) // 128 * 128)
    else:
        tL = tl_min
        tB = max(8, int((_PAYLOAD_BUDGET // tL - pisz) // (2 * isz)) // 8 * 8)
        tB = min(tB, B)

    grid = (pl.cdiv(L, tL), pl.cdiv(B, tB))  # L tiles OUTER -> pe re-DMA elided over batch

    out2 = pl.pallas_call(
        _pe_add_kernel,
        out_shape=jax.ShapeDtypeStruct((B, L), x.dtype),
        grid=grid,
        in_specs=[
            pl.BlockSpec((tB, tL), lambda l, b: (b, l)),   # x tile (lane-dense)
            pl.BlockSpec((1, tL), lambda l, b: (0, l)),    # pe tile (batch-invariant)
        ],
        out_specs=pl.BlockSpec((tB, tL), lambda l, b: (b, l)),
        compiler_params=pltpu.CompilerParams(
            dimension_semantics=("parallel", "parallel"),
        ),
        cost_estimate=_cost(B, S, D, isz, pisz),
    )(x2, pe2)
    return out2.reshape(B, S, D)


def positional_encoding(x, pe):
    """x: (B, S, D); pe: (max_len, D) f32 buffer. Returns dropout_eval(x + pe[:S])."""
    B, S, D = x.shape
    assert pe.shape[0] >= S and pe.shape[1] == D

    pe_s = pe[:S]  # cheap slice; keep f32 — the add is done in f32 in-kernel

    if D % 128 == 0:
        return _pos_enc_3d(x, pe_s)
    return _pos_enc_flat(x, pe_s)


if __name__ == "__main__":
    key = jax.random.PRNGKey(0)

    # Case 1: shapes consistent with the module's typical use (D < 128 ->
    # lane-dense flattened path). batch=2, seq=16, d_model=32.
    B, S, D = 2, 16, 32
    x = jax.random.normal(key, (B, S, D), jnp.float32)
    pe = make_pe_table(D, max_len=5000)
    out = positional_encoding(x, pe)
    jax.block_until_ready(out)
    ref = x + pe[:S][None, :, :]
    assert out.shape == (B, S, D)
    assert jnp.allclose(out, ref, atol=1e-6), "mismatch vs reference (flat path)"

    # Case 2: d_model multiple of 128 -> batch-folded 3D path.
    B2, S2, D2 = 2, 64, 128
    x2 = jax.random.normal(jax.random.PRNGKey(1), (B2, S2, D2), jnp.float32)
    pe2 = make_pe_table(D2, max_len=5000)
    out2 = positional_encoding(x2, pe2)
    jax.block_until_ready(out2)
    ref2 = x2 + pe2[:S2][None, :, :]
    assert jnp.allclose(out2, ref2, atol=1e-6), "mismatch vs reference (3D path)"

    print("KERNEL_OK")
</pallas_src>

<mosaic_0001>
module attributes {stable_mosaic.version = 11 : i64} {
  func.func @_pe_add_kernel(%arg0: i32, %arg1: i32, %arg2: memref<2x512xf32, #tpu.memory_space<vmem>>, %arg3: memref<1x512xf32, #tpu.memory_space<vmem>>, %arg4: memref<2x512xf32, #tpu.memory_space<vmem>>) attributes {dimension_semantics = [#tpu.dimension_semantics<parallel>, #tpu.dimension_semantics<parallel>], iteration_bounds = array<i64: 1, 1>, scalar_prefetch = 0 : i64, scratch_operands = 0 : i64, tpu.core_type = #tpu.core_type<tc>, window_params = [{transform_indices = @transform_0, window_bounds = array<i64: 2, 512>}, {transform_indices = @transform_1, window_bounds = array<i64: 1, 512>}, {transform_indices = @transform_2, window_bounds = array<i64: 2, 512>}]} {
    %c0 = arith.constant 0 : index
    %c0_0 = arith.constant 0 : index
    %0 = vector.load %arg2[%c0, %c0_0] : memref<2x512xf32, #tpu.memory_space<vmem>>, vector<2x512xf32>
    %c0_1 = arith.constant 0 : index
    %c0_2 = arith.constant 0 : index
    %1 = vector.load %arg3[%c0_1, %c0_2] : memref<1x512xf32, #tpu.memory_space<vmem>>, vector<1x512xf32>
    %2 = vector.broadcast %1 : vector<1x512xf32> to vector<2x512xf32>
    %3 = arith.addf %0, %2 : vector<2x512xf32>
    %c0_3 = arith.constant 0 : index
    %c0_4 = arith.constant 0 : index
    %4 = vector.load %arg4[%c0_3, %c0_4] : memref<2x512xf32, #tpu.memory_space<vmem>>, vector<2x512xf32>
    tpu.vector_store %arg4[%c0_3, %c0_4], %3 {strides = array<i32>} : memref<2x512xf32, #tpu.memory_space<vmem>>, vector<2x512xf32>,
    return
  }
  func.func @transform_0(%arg0: i32, %arg1: i32) -> (i32, i32) {
    %c0_i32 = arith.constant 0 : i32
    return %arg1, %arg0 : i32, i32
  }
  func.func @transform_1(%arg0: i32, %arg1: i32) -> (i32, i32) {
    %c0_i32 = arith.constant 0 : i32
    %c0_i32_0 = arith.constant 0 : i32
    return %c0_i32, %arg0 : i32, i32
  }
  func.func @transform_2(%arg0: i32, %arg1: i32) -> (i32, i32) {
    %c0_i32 = arith.constant 0 : i32
    return %arg1, %arg0 : i32, i32
  }
}

</mosaic_0001>

<bundles_post_ra>
// kernel: tpu_custom_call.1
= control target key start
LH: loop header
LB: loop body
LE: loop exit
PB: predicated region body
PF: predicated region fallthrough
CT: control target
= control target key end

     0   :  { %7 = vsyncpa [#allocation3], 0  ;;  %s222_s0 = inlined_call_operand.hbm [shape: f32[2,512], index: 0, kind: input, shape index: {}]   ;;  %s223_s1 = inlined_call_operand.hbm [shape: f32[1,512], index: 1, kind: input, shape index: {}]   ;;  %s224_s2 = inlined_call_operand.hbm [shape: f32[2,512], index: 2, kind: output, shape index: {}]  }
   0x1   :  { %8 = vsyncpa [#allocation6], 0 }
   0x2   :  { %9 = vsyncpa [#allocation4], 0  ;;  %s167_s9 = smov [#allocation2]   ;;  %s168_s11 = smov [#allocation5]  }
   0x3   :  { %s16_s10 = sshll.u32 %s167_s9, 4  ;;  %s26_s12 = sshll.u32 %s168_s11, 4  ;;  %s17_s10 = int_to_ptr.vmem [resolvable:$true] %s16_s10  ;;  %s27_s12 = int_to_ptr.vmem [resolvable:$true] %s26_s12 }
   0x4   :  { %s95_s15 = scalar_lea.hbm %s222_s0, 128 }
   0x5   :  { %p96_p0 = scmp.ne.s32.totalorder %s222_s0, %s95_s15  ;;  %p99_p1 = scmp.lt.u32.totalorder %s95_s15, %s222_s0 }
   0x7   :  { %p101_p2 = pnand %p99_p1, %p96_p0 }
   0x9   :  { %104 = shalt.err (!%p101_p2)
}
   0xa   :  { %s105_s20 = scalar_lea.vmem %s17_s10, 128  ;;  %p110_p4 = scmp.lt.s32.totalorder %s17_s10, %s17_s10 }
   0xb   :  { %p106_p3 = scmp.ne.s32.totalorder %s17_s10, %s105_s20  ;;  %p111_p5 = scmp.lt.s32.totalorder %s105_s20, %s105_s20 }
   0xd   :  { %p112_p6 = por %p111_p5, %p110_p4 }
   0xf   :  { %p113_p7 = pnand %p112_p6, %p106_p3 }
  0x11   :  { %116 = shalt.err (!%p113_p7)
}
  0x12   :  { %19 = dma.hbm_to_vmem [thread:$0]  %s222_s0, 128, %s17_s10, [#allocation3]  }
  0x13   :  { %s117_s25 = scalar_lea.hbm %s223_s1, 64 }
  0x14   :  { %p118_p8 = scmp.ne.s32.totalorder %s223_s1, %s117_s25  ;;  %p121_p9 = scmp.lt.u32.totalorder %s117_s25, %s223_s1 }
  0x16   :  { %p123_p10 = pnand %p121_p9, %p118_p8 }
  0x18   :  { %126 = shalt.err (!%p123_p10)
}
  0x19   :  { %s127_s30 = scalar_lea.vmem %s27_s12, 64  ;;  %p132_p12 = scmp.lt.s32.totalorder %s27_s12, %s27_s12 }
  0x1a   :  { %p128_p11 = scmp.ne.s32.totalorder %s27_s12, %s127_s30  ;;  %p133_p13 = scmp.lt.s32.totalorder %s127_s30, %s127_s30 }
  0x1c   :  { %p134_p0 = por %p133_p13, %p132_p12 }
  0x1e   :  { %p135_p1 = pnand %p134_p0, %p128_p11 }
  0x20   :  { %138 = shalt.err (!%p135_p1)
}
  0x21   :  { %29 = dma.hbm_to_vmem [thread:$0]  %s223_s1, 64, %s27_s12, [#allocation6]  }
  0x22   :  { %161 = dma.done.wait [#allocation3], 128  }
  0x23   :  { %162 = vsyncadd [#allocation3], 4294967168 }
  0x24   :  { %163 = dma.done.wait [#allocation6], 64  }
  0x25   :  { %164 = vsyncadd [#allocation6], 4294967232  ;;  %v39_v0 = vlaneseq  ;;  %v169_v1 = vmov 1983009808   ;;  %v37_v9 = vld [vmem:[#allocation5] sm:$0xf] }
  0x26   :  { %v58_v2 = vunpack.c.l.s4 %v169_v1  ;;  %v36_v19 = vld [vmem:[#allocation2] sm:$0xff]  ;;  %s170_s1 = smov [#allocation7]  }
  0x27   :  { %v40_v3 = vshrl.u32 %v39_v0, 7  ;;  %s81_s4 = sshll.u32 %s170_s1, 4  ;;  %s82_s4 = int_to_ptr.vmem [resolvable:$true] %s81_s4 }
  0x28   :  { %v59_v4 = vunpack.c.0.s8 %v58_v2  ;;  %s139_s5 = scalar_lea.vmem %s82_s4, 128  ;;  %p144_p3 = scmp.lt.s32.totalorder %s82_s4, %s82_s4 }
  0x29   :  { %v41_v5 = vsub.s32 0, %v40_v3  ;;  %v45_v6 = vsub.s32 1, %v40_v3  ;;  %v49_v7 = vsub.s32 2, %v40_v3  ;;  %v53_v8 = vsub.s32 3, %v40_v3  ;;  %p140_p2 = scmp.ne.s32.totalorder %s82_s4, %s139_s5  ;;  %p145_p4 = scmp.lt.s32.totalorder %s139_s5, %s139_s5 }
  0x2a   :  { %v62_v10 = vsub.s32 %v59_v4, %v40_v3 }
  0x2b   :  { %v42_v11 = vrot.slane %v37_v9, %v41_v5  ;;  %v46_v12 = vrot.slane %v37_v9, %v45_v6  ;;  %v50_v13 = vrot.slane %v37_v9, %v49_v7  ;;  %v54_v14 = vrot.slane %v37_v9, %v53_v8  ;;  %p146_p5 = por %p145_p4, %p144_p3 }
  0x2d   :  { %v55_v15 = vcombine.low %v42_v11, %v46_v12  ;;  %v56_v16 = vcombine.low %v50_v13, %v54_v14  ;;  %p147_p6 = pnand %p146_p5, %p140_p2 }
  0x2f   :  { %v63_v17 = vrot.slane %v55_v15, %v62_v10  ;;  %v70_v18 = vrot.slane %v56_v16, %v62_v10 }
  0x31   :  { %v71_v20 = vcombine.low %v63_v17, %v70_v18 }
  0x33   :  { %v73_v21 = vadd.f32 %v71_v20, %v36_v19 }
  0x35   :  { %74 = vst [vmem:[#allocation7] sm:$0xff] %v73_v21 }
  0x36   :  { %150 = shalt.err (!%p147_p6)
}
  0x37   :  { %s151_s8 = scalar_lea.hbm %s224_s2, 128 }
  0x38   :  { %p152_p7 = scmp.ne.s32.totalorder %s224_s2, %s151_s8  ;;  %p155_p8 = scmp.lt.u32.totalorder %s151_s8, %s224_s2 }
  0x3a   :  { %p157_p9 = pnand %p155_p8, %p152_p7 }
  0x3c   :  { %160 = shalt.err (!%p157_p9)
}
  0x3d   :  { %84 = dma.vmem_to_hbm [thread:$0]  %s82_s4, 128, %s224_s2, [#allocation4]  }
  0x3e   :  { %165 = dma.done.wait [#allocation4], 128  }
  0x3f   :  { %166 = vsyncadd [#allocation4], 4294967168 }
  0x40   :  { %88 = vsyncpa [#allocation3], 1 }
  0x41   :  { %89 = vsyncpa [#allocation6], 1 }
  0x42   :  { %90 = vsyncpa [#allocation4], 1 }

</bundles_post_ra>
